<compile_context>
chip_gen: v7x
topology: tpu7x:2x2x1
jax: 0.10.0
libtpu: 0.0.40
codegen_flags: <defaults>
</compile_context>

<pallas_src>
import jax
import jax.numpy as jnp
from jax import lax
from jax.experimental import pallas as pl
from jax.experimental.pallas import tpu as pltpu


def _round_up(n, m):
    return ((n + m - 1) // m) * m


def lstm_fused_kernel(x_ref,      # (1, T*Bt, I)  bf16  (time-major rows: row = t*Bt + b)
                      wih_ref,    # (I, G)        bf16  G = 4*H_pad, gate-major, padded
                      whh_ref,    # (H_pad, G)    bf16
                      b_ref,      # (1, G)        f32   combined bias (b_ih + b_hh), padded
                      h_out_ref,  # (Bt, H_pad)   f32
                      c_out_ref,  # (Bt, H_pad)   f32
                      gx_sc):     # (T*Bt, G)     f32   VMEM scratch for gates_x
    Bt = h_out_ref.shape[0]
    Hp = whh_ref.shape[0]
    T = x_ref.shape[1] // Bt

    # ---- (1) Hoisted input projection: one big MXU matmul over all T*Bt rows.
    #      Bias is added here, once, outside the recurrence.
    x_all = x_ref[0]                                            # (T*Bt, I) bf16
    gx_sc[...] = (jnp.dot(x_all, wih_ref[...],
                          preferred_element_type=jnp.float32)
                  + b_ref[...])                                 # (T*Bt, G) f32

    # ---- (2) Sequential recurrence: entire T loop inside the kernel, h/c carried in vregs.
    def step(t, carry):
        h, c = carry
        row0 = pl.multiple_of(t * Bt, 8)                        # aligned sublane offset
        g_x = gx_sc[pl.ds(row0, Bt), :]                         # (Bt, G) f32, timestep t
        gates = g_x + jnp.dot(h.astype(jnp.bfloat16), whh_ref[...],
                              preferred_element_type=jnp.float32)
        # Gate slices are lane-aligned (Hp is a multiple of 128).
        i_g = jax.nn.sigmoid(gates[:, 0 * Hp:1 * Hp])
        f_g = jax.nn.sigmoid(gates[:, 1 * Hp:2 * Hp])
        g_g = jnp.tanh(gates[:, 2 * Hp:3 * Hp])
        o_g = jax.nn.sigmoid(gates[:, 3 * Hp:4 * Hp])
        c_new = f_g * c + i_g * g_g
        h_new = o_g * jnp.tanh(c_new)
        return h_new, c_new

    h0 = jnp.zeros((Bt, Hp), jnp.float32)
    c0 = jnp.zeros((Bt, Hp), jnp.float32)
    h_f, c_f = lax.fori_loop(0, T, step, (h0, c0))

    h_out_ref[...] = h_f
    c_out_ref[...] = c_f


def encoder_forward(x_btI, w_ih, w_hh, b_ih, b_hh):
    """x_btI: (B, T, I) float32 (batch_first, like the PyTorch module).
    Weights use PyTorch nn.LSTM layout: w_ih (4H, I), w_hh (4H, H), biases (4H,).
    Returns (hidden, cell), each (1, B, H) — matching nn.LSTM's (h_n, c_n)."""
    B, T, I = x_btI.shape
    H4 = w_ih.shape[0]
    H = H4 // 4

    # ---- padded, gate-major, MXU-friendly parameter layout -------------------------------
    Hp = _round_up(H, 128)            # lane-aligned gate width
    G = 4 * Hp
    B_pad = _round_up(B, 8)           # sublane-aligned batch
    B_TILE = min(B_pad, 128)          # batch tile = one grid step (parallel axis)
    B_pad = _round_up(B_pad, B_TILE)
    nb = B_pad // B_TILE

    def pad_gate_rows(w, pad_cols):
        # w: (4H, C) stacked gate-major [i; f; g; o] -> (4*Hp, C + pad_cols), zero padding
        return jnp.concatenate(
            [jnp.pad(g, ((0, Hp - H), (0, pad_cols))) for g in jnp.split(w, 4, axis=0)],
            axis=0)

    wih_t = jnp.transpose(pad_gate_rows(w_ih, 0), (1, 0)).astype(jnp.bfloat16)      # (I, G)
    whh_t = jnp.transpose(pad_gate_rows(w_hh, Hp - H), (1, 0)).astype(jnp.bfloat16)  # (Hp, G)
    bias = jnp.concatenate(
        [jnp.pad(g, (0, Hp - H)) for g in jnp.split(b_ih + b_hh, 4)],
        axis=0).reshape(1, G).astype(jnp.float32)                                    # (1, G)

    # ---- x: time-major, batch-padded, grouped into batch tiles, bf16 ---------------------
    # Final layout (nb, T*B_TILE, I): inside a tile, row = t*B_TILE + (batch index in tile),
    # so gates_x comes out naturally time-major and the recurrence slices it contiguously.
    x_tm = jnp.transpose(x_btI, (1, 0, 2))                       # (T, B, I)  (tiny tensor)
    x_tm = jnp.pad(x_tm, ((0, 0), (0, B_pad - B), (0, 0)))
    x_tiled = (x_tm.reshape(T, nb, B_TILE, I)
                   .transpose(1, 0, 2, 3)
                   .reshape(nb, T * B_TILE, I)
                   .astype(jnp.bfloat16))

    h_p, c_p = pl.pallas_call(
        lstm_fused_kernel,
        out_shape=(jax.ShapeDtypeStruct((B_pad, Hp), jnp.float32),
                   jax.ShapeDtypeStruct((B_pad, Hp), jnp.float32)),
        grid_spec=pltpu.PrefetchScalarGridSpec(
            num_scalar_prefetch=0,
            grid=(nb,),                                          # batch tiles only
            in_specs=[
                pl.BlockSpec((1, T * B_TILE, I), lambda b: (b, 0, 0)),   # x tile
                pl.BlockSpec((I, G), lambda b: (0, 0)),                  # W_ih^T (resident)
                pl.BlockSpec((Hp, G), lambda b: (0, 0)),                 # W_hh^T (resident)
                pl.BlockSpec((1, G), lambda b: (0, 0)),                  # bias   (resident)
            ],
            out_specs=[
                pl.BlockSpec((B_TILE, Hp), lambda b: (b, 0)),            # hidden
                pl.BlockSpec((B_TILE, Hp), lambda b: (b, 0)),            # cell
            ],
            scratch_shapes=[
                pltpu.VMEM((T * B_TILE, G), jnp.float32),                # gates_x
            ],
        ),
        compiler_params=pltpu.CompilerParams(
            # Batch tiles are independent -> safe to shard across cores (v7x megacore).
            # Time is NOT a grid axis anymore; the recurrence is sequential inside the body.
            dimension_semantics=("parallel",)),
    )(x_tiled, wih_t, whh_t, bias)

    # Strip batch / hidden padding; add nn.LSTM's leading (num_layers*num_directions)=1 axis.
    return h_p[None, :B, :H], c_p[None, :B, :H]


def _reference_lstm(x_btI, w_ih, w_hh, b_ih, b_hh):
    """Pure-JAX f32 reference of the same recurrence (nn.LSTM semantics)."""
    B, T, I = x_btI.shape
    H = w_hh.shape[1]

    def step(carry, x_t):
        h, c = carry
        gates = x_t @ w_ih.T + b_ih + h @ w_hh.T + b_hh
        i, f, g, o = jnp.split(gates, 4, axis=-1)
        c = jax.nn.sigmoid(f) * c + jax.nn.sigmoid(i) * jnp.tanh(g)
        h = jax.nn.sigmoid(o) * jnp.tanh(c)
        return (h, c), None

    init = (jnp.zeros((B, H), jnp.float32), jnp.zeros((B, H), jnp.float32))
    (h, c), _ = jax.lax.scan(step, init, jnp.transpose(x_btI, (1, 0, 2)))
    return h[None], c[None]


if __name__ == "__main__":
    # Small shapes consistent with the module's forward: x is (batch, seq, input_size).
    B, T, INPUT_SIZE, HIDDEN_SIZE = 2, 8, 4, 32

    key = jax.random.PRNGKey(0)
    kx, k1, k2, k3, k4 = jax.random.split(key, 5)

    x = jax.random.normal(kx, (B, T, INPUT_SIZE), dtype=jnp.float32)

    # PyTorch nn.LSTM parameter shapes: weight_ih (4H, I), weight_hh (4H, H), biases (4H,)
    bound = 1.0 / jnp.sqrt(HIDDEN_SIZE)
    w_ih = jax.random.uniform(k1, (4 * HIDDEN_SIZE, INPUT_SIZE), jnp.float32, -bound, bound)
    w_hh = jax.random.uniform(k2, (4 * HIDDEN_SIZE, HIDDEN_SIZE), jnp.float32, -bound, bound)
    b_ih = jax.random.uniform(k3, (4 * HIDDEN_SIZE,), jnp.float32, -bound, bound)
    b_hh = jax.random.uniform(k4, (4 * HIDDEN_SIZE,), jnp.float32, -bound, bound)

    hidden, cell = encoder_forward(x, w_ih, w_hh, b_ih, b_hh)
    jax.block_until_ready((hidden, cell))

    # Sanity check vs. pure-f32 reference. The kernel uses bf16 matmul inputs with f32
    # accumulation (per perf review), so allow a bf16-scale tolerance.
    h_ref, c_ref = _reference_lstm(x, w_ih, w_hh, b_ih, b_hh)
    assert hidden.shape == (1, B, HIDDEN_SIZE) and cell.shape == (1, B, HIDDEN_SIZE)
    assert jnp.allclose(hidden, h_ref, atol=3e-2), "hidden mismatch vs reference"
    assert jnp.allclose(cell, c_ref, atol=3e-2), "cell mismatch vs reference"

    print("KERNEL_OK")
</pallas_src>

<mosaic_0001>
module attributes {stable_mosaic.version = 11 : i64} {
  func.func @lstm_fused_kernel(%arg0: i32, %arg1: memref<1x64x4xbf16, #tpu.memory_space<vmem>>, %arg2: memref<4x512xbf16, #tpu.memory_space<vmem>>, %arg3: memref<128x512xbf16, #tpu.memory_space<vmem>>, %arg4: memref<1x512xf32, #tpu.memory_space<vmem>>, %arg5: memref<8x128xf32, #tpu.memory_space<vmem>>, %arg6: memref<8x128xf32, #tpu.memory_space<vmem>>, %arg7: memref<64x512xf32, #tpu.memory_space<vmem>>) attributes {dimension_semantics = [#tpu.dimension_semantics<parallel>], iteration_bounds = array<i64: 1>, scalar_prefetch = 0 : i64, scratch_operands = 1 : i64, tpu.core_type = #tpu.core_type<tc>, window_params = [{transform_indices = @transform_0, window_bounds = array<i64: 1, 64, 4>}, {pipeline_mode = #tpu.pipeline_mode<synchronous>, transform_indices = @transform_1, window_bounds = array<i64: 4, 512>}, {pipeline_mode = #tpu.pipeline_mode<synchronous>, transform_indices = @transform_2, window_bounds = array<i64: 128, 512>}, {pipeline_mode = #tpu.pipeline_mode<synchronous>, transform_indices = @transform_3, window_bounds = array<i64: 1, 512>}, {transform_indices = @transform_4, window_bounds = array<i64: 8, 128>}, {transform_indices = @transform_5, window_bounds = array<i64: 8, 128>}]} {
    %c0 = arith.constant 0 : index
    %c0_0 = arith.constant 0 : index
    %c0_1 = arith.constant 0 : index
    %0 = vector.load %arg1[%c0, %c0_0, %c0_1] : memref<1x64x4xbf16, #tpu.memory_space<vmem>>, vector<1x64x4xbf16>
    %1 = vector.shape_cast %0 : vector<1x64x4xbf16> to vector<64x4xbf16>
    %c0_2 = arith.constant 0 : index
    %c0_3 = arith.constant 0 : index
    %2 = vector.load %arg2[%c0_2, %c0_3] : memref<4x512xbf16, #tpu.memory_space<vmem>>, vector<4x512xbf16>
    %cst = arith.constant dense<0.000000e+00> : vector<64x512xf32>
    %3 = tpu.matmul %1, %2, %cst {dimension_numbers = #tpu.dot_dimension_numbers<[1], [0], [0], [1], [0, 0, 1, 1], [], []>} : vector<64x4xbf16>, vector<4x512xbf16>, vector<64x512xf32> -> vector<64x512xf32>
    %c0_4 = arith.constant 0 : index
    %c0_5 = arith.constant 0 : index
    %4 = vector.load %arg4[%c0_4, %c0_5] : memref<1x512xf32, #tpu.memory_space<vmem>>, vector<1x512xf32>
    %5 = vector.broadcast %4 : vector<1x512xf32> to vector<64x512xf32>
    %6 = arith.addf %3, %5 : vector<64x512xf32>
    %c0_6 = arith.constant 0 : index
    %c0_7 = arith.constant 0 : index
    %7 = vector.load %arg7[%c0_6, %c0_7] : memref<64x512xf32, #tpu.memory_space<vmem>>, vector<64x512xf32>
    tpu.vector_store %arg7[%c0_6, %c0_7], %6 {strides = array<i32>} : memref<64x512xf32, #tpu.memory_space<vmem>>, vector<64x512xf32>,
    %cst_8 = arith.constant 0.000000e+00 : f32
    %8 = vector.broadcast %cst_8 : f32 to vector<8x128xf32>
    %cst_9 = arith.constant 0.000000e+00 : f32
    %9 = vector.broadcast %cst_9 : f32 to vector<8x128xf32>
    %c0_i32 = arith.constant 0 : i32
    %c8_i32 = arith.constant 8 : i32
    %10 = arith.addi %c0_i32, %c8_i32 : i32
    %c1_i32 = arith.constant 1 : i32
    %11:2 = scf.for %arg8 = %c0_i32 to %10 step %c1_i32 iter_args(%arg9 = %8, %arg10 = %9) -> (vector<8x128xf32>, vector<8x128xf32>)  : i32 {
      %c8_i32_15 = arith.constant 8 : i32
      %14 = arith.muli %arg8, %c8_i32_15 : i32
      %15 = tpu.assume_multiple %14, 8 : i32
      %16 = arith.index_cast %15 : i32 to index
      %c0_16 = arith.constant 0 : index
      %17 = vector.load %arg7[%16, %c0_16] : memref<64x512xf32, #tpu.memory_space<vmem>>, vector<8x512xf32>
      %18 = arith.truncf %arg9 : vector<8x128xf32> to vector<8x128xbf16>
      %c0_17 = arith.constant 0 : index
      %c0_18 = arith.constant 0 : index
      %19 = vector.load %arg3[%c0_17, %c0_18] : memref<128x512xbf16, #tpu.memory_space<vmem>>, vector<128x512xbf16>
      %cst_19 = arith.constant dense<0.000000e+00> : vector<8x512xf32>
      %20 = tpu.matmul %18, %19, %cst_19 {dimension_numbers = #tpu.dot_dimension_numbers<[1], [0], [0], [1], [0, 0, 1, 1], [], []>} : vector<8x128xbf16>, vector<128x512xbf16>, vector<8x512xf32> -> vector<8x512xf32>
      %21 = arith.addf %17, %20 : vector<8x512xf32>
      %22 = vector.extract_strided_slice %21 {offsets = [0, 0], sizes = [8, 128], strides = [1, 1]} : vector<8x512xf32> to vector<8x128xf32>
      %23 = arith.negf %22 : vector<8x128xf32>
      %24 = math.exp %23 : vector<8x128xf32>
      %cst_20 = arith.constant 1.000000e+00 : f32
      %25 = vector.broadcast %cst_20 : f32 to vector<8x128xf32>
      %26 = arith.addf %25, %24 : vector<8x128xf32>
      %27 = arith.divf %25, %26 : vector<8x128xf32>
      %28 = vector.extract_strided_slice %21 {offsets = [0, 128], sizes = [8, 128], strides = [1, 1]} : vector<8x512xf32> to vector<8x128xf32>
      %29 = arith.negf %28 : vector<8x128xf32>
      %30 = math.exp %29 : vector<8x128xf32>
      %cst_21 = arith.constant 1.000000e+00 : f32
      %31 = vector.broadcast %cst_21 : f32 to vector<8x128xf32>
      %32 = arith.addf %31, %30 : vector<8x128xf32>
      %33 = arith.divf %31, %32 : vector<8x128xf32>
      %34 = vector.extract_strided_slice %21 {offsets = [0, 256], sizes = [8, 128], strides = [1, 1]} : vector<8x512xf32> to vector<8x128xf32>
      %35 = math.tanh %34 : vector<8x128xf32>
      %36 = vector.extract_strided_slice %21 {offsets = [0, 384], sizes = [8, 128], strides = [1, 1]} : vector<8x512xf32> to vector<8x128xf32>
      %37 = arith.negf %36 : vector<8x128xf32>
      %38 = math.exp %37 : vector<8x128xf32>
      %cst_22 = arith.constant 1.000000e+00 : f32
      %39 = vector.broadcast %cst_22 : f32 to vector<8x128xf32>
      %40 = arith.addf %39, %38 : vector<8x128xf32>
      %41 = arith.divf %39, %40 : vector<8x128xf32>
      %42 = arith.mulf %33, %arg10 : vector<8x128xf32>
      %43 = arith.mulf %27, %35 : vector<8x128xf32>
      %44 = arith.addf %42, %43 : vector<8x128xf32>
      %45 = math.tanh %44 : vector<8x128xf32>
      %46 = arith.mulf %41, %45 : vector<8x128xf32>
      scf.yield %46, %44 : vector<8x128xf32>, vector<8x128xf32>
    }
    %c8_i32_10 = arith.constant 8 : i32
    %c0_11 = arith.constant 0 : index
    %c0_12 = arith.constant 0 : index
    %12 = vector.load %arg5[%c0_11, %c0_12] : memref<8x128xf32, #tpu.memory_space<vmem>>, vector<8x128xf32>
    tpu.vector_store %arg5[%c0_11, %c0_12], %11#0 {strides = array<i32>} : memref<8x128xf32, #tpu.memory_space<vmem>>, vector<8x128xf32>,
    %c0_13 = arith.constant 0 : index
    %c0_14 = arith.constant 0 : index
    %13 = vector.load %arg6[%c0_13, %c0_14] : memref<8x128xf32, #tpu.memory_space<vmem>>, vector<8x128xf32>
    tpu.vector_store %arg6[%c0_13, %c0_14], %11#1 {strides = array<i32>} : memref<8x128xf32, #tpu.memory_space<vmem>>, vector<8x128xf32>,
    return
  }
  func.func @transform_0(%arg0: i32) -> (i32, i32, i32) {
    %c0_i32 = arith.constant 0 : i32
    %c0_i32_0 = arith.constant 0 : i32
    %c0_i32_1 = arith.constant 0 : i32
    return %arg0, %c0_i32, %c0_i32_0 : i32, i32, i32
  }
  func.func @transform_1(%arg0: i32) -> (i32, i32) {
    %c0_i32 = arith.constant 0 : i32
    %c0_i32_0 = arith.constant 0 : i32
    %c0_i32_1 = arith.constant 0 : i32
    return %c0_i32, %c0_i32_0 : i32, i32
  }
  func.func @transform_2(%arg0: i32) -> (i32, i32) {
    %c0_i32 = arith.constant 0 : i32
    %c0_i32_0 = arith.constant 0 : i32
    %c0_i32_1 = arith.constant 0 : i32
    return %c0_i32, %c0_i32_0 : i32, i32
  }
  func.func @transform_3(%arg0: i32) -> (i32, i32) {
    %c0_i32 = arith.constant 0 : i32
    %c0_i32_0 = arith.constant 0 : i32
    %c0_i32_1 = arith.constant 0 : i32
    return %c0_i32, %c0_i32_0 : i32, i32
  }
  func.func @transform_4(%arg0: i32) -> (i32, i32) {
    %c0_i32 = arith.constant 0 : i32
    %c0_i32_0 = arith.constant 0 : i32
    return %arg0, %c0_i32 : i32, i32
  }
  func.func @transform_5(%arg0: i32) -> (i32, i32) {
    %c0_i32 = arith.constant 0 : i32
    %c0_i32_0 = arith.constant 0 : i32
    return %arg0, %c0_i32 : i32, i32
  }
}

</mosaic_0001>

<bundles_post_ra>
// kernel: tpu_custom_call.1
= control target key start
LH: loop header
LB: loop body
LE: loop exit
PB: predicated region body
PF: predicated region fallthrough
CT: control target
= control target key end

     0   :  { %11 = vsyncpa [#allocation4], 0  ;;  %s1090_s0 = inlined_call_operand.vmem [shape: bf16[1,64,4], index: 0, kind: input, shape index: {}]   ;;  %s1091_s1 = inlined_call_operand.vmem [shape: bf16[4,512], index: 1, kind: input, shape index: {}]   ;;  %s1092_s2 = inlined_call_operand.hbm [shape: bf16[128,512], index: 2, kind: input, shape index: {}]   ;;  %s1093_s3 = inlined_call_operand.vmem [shape: f32[1,512], index: 3, kind: input, shape index: {}]   ;;  %s1094_s4 = inlined_call_operand.hbm [shape: f32[8,128], index: 4, kind: output, shape index: {0}]   ;;  %s1095_s5 = inlined_call_operand.hbm [shape: f32[8,128], index: 5, kind: output, shape index: {1}]  }
   0x1   :  { %12 = vsyncpa [#allocation5], 0 }
   0x2   :  { %13 = vsyncpa [#allocation8], 0  ;;  %s924_s18 = smov [#allocation3]   ;;  %s828_s22 = scalar_lea.hbm %s1092_s2, 4096 }
   0x3   :  { %s23_s19 = sshll.u32 %s924_s18, 4  ;;  %p829_p0 = scmp.ne.s32.totalorder %s1092_s2, %s828_s22  ;;  %s24_s19 = int_to_ptr.vmem [resolvable:$true] %s23_s19 }
   0x4   :  { %p832_p1 = scmp.lt.u32.totalorder %s828_s22, %s1092_s2 }
   0x6   :  { %p834_p2 = pnand %p832_p1, %p829_p0 }
   0x8   :  { %837 = shalt.err (!%p834_p2)
}
   0x9   :  { %s838_s27 = scalar_lea.vmem %s24_s19, 4096  ;;  %p843_p4 = scmp.lt.s32.totalorder %s24_s19, %s24_s19 }
   0xa   :  { %p839_p3 = scmp.ne.s32.totalorder %s24_s19, %s838_s27  ;;  %p844_p5 = scmp.lt.s32.totalorder %s838_s27, %s838_s27 }
   0xc   :  { %p845_p6 = por %p844_p5, %p843_p4 }
   0xe   :  { %p846_p7 = pnand %p845_p6, %p839_p3 }
  0x10   :  { %849 = shalt.err (!%p846_p7)
}
  0x11   :  { %s925_s28 = smov 256   ;;  %s926_s29 = smov 16  }
  0x12   :  { %29 = dma.hbm_to_vmem [thread:$0]  %s1092_s2, 4096, %s24_s19, [#allocation4], %s925_s28, %s925_s28, %s926_s29  }
  0x13   :  { %906 = dma.done.wait [#allocation4], 4096  }
  0x14   :  { %907 = vsyncadd [#allocation4], 4294963200  ;;  %v47_v0 = vlaneseq  ;;  %v927_v1 = vmov 1983009808   ;;  %v928_v3 = vmov 0   ;;  %v44_v7 = vld [vmem:[%s1091_s1] sm:$0xff] }
  0x15   :  { %v90_v2 = vunpack.c.l.s4 %v927_v1  ;;  %163 = vmatprep.mubr.bf16.mxu0 %v928_v3  ;;  %236 = vmatprep.mubr.bf16.mxu1 %v928_v3  ;;  %vm118_vm0 = vcmask 1041408   ;;  %v88_v9 = vcombine.high %v44_v7, %v44_v7  ;;  %v760_v15 = vld [vmem:[%s1090_s0] sm:$0xff]   ;;  %vm105_vm1 = vcmask 31744   ;;  %v761_v16 = vld [vmem:[%s1090_s0 + $0x8] sm:$0xff]   ;;  %v762_v17 = vld [vmem:[%s1090_s0 + $0x10] sm:$0xff]  }
  0x16   :  { %v48_v4 = vshrl.u32 %v47_v0, 7  ;;  %v763_v18 = vld [vmem:[%s1090_s0 + $0x18] sm:$0xff]   ;;  %v45_v20 = vld [vmem:[%s1093_s3] sm:$0xf]  ;;  %s1044_s0 = smov 0  }
  0x17   :  { %v91_v5 = vunpack.c.0.s8 %v90_v2 }
  0x18   :  { %v49_v19 = vsub.s32 0, %v48_v4  ;;  %v53_v21 = vsub.s32 1, %v48_v4  ;;  %v57_v22 = vsub.s32 2, %v48_v4  ;;  %v61_v23 = vsub.s32 3, %v48_v4 }
  0x19   :  { %v94_v6 = vsub.s32 %v91_v5, %v48_v4 }
  0x1a   :  { %v1000_v24 = vrot.slane %v45_v20, %v49_v19  ;;  %v1002_v25 = vrot.slane %v45_v20, %v53_v21  ;;  %v1004_v26 = vrot.slane %v45_v20, %v57_v22  ;;  %v1006_v28 = vrot.slane %v45_v20, %v61_v23 }
  0x1b   :  { %v95_v8 = vrot.slane %v44_v7, %v94_v6  ;;  %v102_v12 = vrot.slane %v88_v9, %v94_v6 }
  0x1d   :  { %v103_v10 = vcombine.high %v95_v8, %v95_v8  ;;  %v120_v11 = vsel %vm118_vm0, %v95_v8, 0  ;;  %v104_v13 = vcombine.high %v102_v12, %v102_v12  ;;  %v126_v14 = vsel %vm118_vm0, %v102_v12, 0 }
  0x1f   :  { %678 = vmatprep.subr.msk.bf16.mxu0 %vm118_vm0, %v103_v10  ;;  %683 = vmatprep.subr.msk.bf16.mxu1 %vm118_vm0, %v104_v13 }
  0x20   :  { %132 = vmatpush1.bf16.msra.mxu0 %v120_v11  ;;  %205 = vmatpush1.bf16.msra.mxu1 %v126_v14 }
  0x23   :  { %679 = vmatmul.mubr.msk.bf16.vlgmr.msra.gmra.mrb[0].mxu0 %vm105_vm1, %v760_v15  ;;  %684 = vmatmul.mubr.msk.bf16.vlgmr.msra.gmra.mrb[0].mxu1 %vm105_vm1, %v760_v15 }
  0x24   :  { %173 = vmatprep.mubr.bf16.mxu0 %v928_v3  ;;  %246 = vmatprep.mubr.bf16.mxu1 %v928_v3 }
  0x2b   :  { %680 = vmatmul.mubr.msk.bf16.gmra.mrb[4].mxu0 %vm105_vm1, %v761_v16  ;;  %685 = vmatmul.mubr.msk.bf16.gmra.mrb[4].mxu1 %vm105_vm1, %v761_v16 }
  0x2c   :  { %183 = vmatprep.mubr.bf16.mxu0 %v928_v3  ;;  %256 = vmatprep.mubr.bf16.mxu1 %v928_v3 }
  0x33   :  { %681 = vmatmul.mubr.msk.bf16.gmra.mrb[8].mxu0 %vm105_vm1, %v762_v17  ;;  %686 = vmatmul.mubr.msk.bf16.gmra.mrb[8].mxu1 %vm105_vm1, %v762_v17 }
  0x34   :  { %193 = vmatprep.mubr.bf16.mxu0 %v928_v3  ;;  %266 = vmatprep.mubr.bf16.mxu1 %v928_v3 }
  0x3b   :  { %682 = vmatmul.mubr.msk.bf16.gmra.mrb[12].mxu0 %vm105_vm1, %v763_v18  ;;  %687 = vmatmul.mubr.msk.bf16.gmra.mrb[12].mxu1 %vm105_vm1, %v763_v18 }
  0xf6   :  { %v165_v27 = vpop.f32.mrb[0].mxu0  ;;  %v238_v33 = vpop.f32.mrb[0].mxu1 }
  0xf7   :  { %v166_v29 = vadd.f32 %v165_v27, %v1000_v24  ;;  %v167_v30 = vpop.f32.mrb[1].mxu0  ;;  %v239_v35 = vadd.f32 %v238_v33, %v1004_v26  ;;  %v240_v37 = vpop.f32.mrb[1].mxu1 }
  0xf8   :  { %v168_v31 = vadd.f32 %v167_v30, %v1002_v25  ;;  %v169_v32 = vpop.f32.mrb[2].mxu0  ;;  %v241_v39 = vadd.f32 %v240_v37, %v1006_v28  ;;  %v242_v40 = vpop.f32.mrb[2].mxu1 }
  0xf9   :  { %277 = vst [vmem:[#allocation2] sm:$0xff] %v166_v29  ;;  %v170_v34 = vadd.f32 %v169_v32, %v1000_v24  ;;  %v171_v36 = vpop.f32.mrb[3].mxu0  ;;  %279 = vst [vmem:[#allocation2 + $0x10] sm:$0xff] %v239_v35  ;;  %v243_v41 = vadd.f32 %v242_v40, %v1004_v26  ;;  %v244_v42 = vpop.f32.mrb[3].mxu1  ;;  %v1042_v32 = vmov 0.0  }
  0xfa   :  { %278 = vst [vmem:[#allocation2 + $0x8] sm:$0xff] %v168_v31  ;;  %v172_v38 = vadd.f32 %v171_v36, %v1002_v25  ;;  %280 = vst [vmem:[#allocation2 + $0x18] sm:$0xff] %v241_v39  ;;  %v245_v43 = vadd.f32 %v244_v42, %v1006_v28 }
  0xfb   :  { %281 = vst [vmem:[#allocation2 + $0x20] sm:$0xff] %v170_v34  ;;  %283 = vst [vmem:[#allocation2 + $0x30] sm:$0xff] %v243_v41 }
  0xfc   :  { %282 = vst [vmem:[#allocation2 + $0x28] sm:$0xff] %v172_v38  ;;  %284 = vst [vmem:[#allocation2 + $0x38] sm:$0xff] %v245_v43 }
  0xfe   :  { %v175_v44 = vpop.f32.mrb[4].mxu0  ;;  %v248_v49 = vpop.f32.mrb[4].mxu1 }
  0xff   :  { %v176_v45 = vadd.f32 %v175_v44, %v1000_v24  ;;  %v177_v46 = vpop.f32.mrb[5].mxu0  ;;  %v249_v51 = vadd.f32 %v248_v49, %v1004_v26  ;;  %v250_v53 = vpop.f32.mrb[5].mxu1 }
 0x100   :  { %v178_v47 = vadd.f32 %v177_v46, %v1002_v25  ;;  %v179_v48 = vpop.f32.mrb[6].mxu0  ;;  %v251_v55 = vadd.f32 %v250_v53, %v1006_v28  ;;  %v252_v56 = vpop.f32.mrb[6].mxu1 }
 0x101   :  { %285 = vst [vmem:[#allocation2 + $0x40] sm:$0xff] %v176_v45  ;;  %v180_v50 = vadd.f32 %v179_v48, %v1000_v24  ;;  %v181_v52 = vpop.f32.mrb[7].mxu0  ;;  %287 = vst [vmem:[#allocation2 + $0x50] sm:$0xff] %v249_v51  ;;  %v253_v57 = vadd.f32 %v252_v56, %v1004_v26  ;;  %v254_v58 = vpop.f32.mrb[7].mxu1 }
 0x102   :  { %286 = vst [vmem:[#allocation2 + $0x48] sm:$0xff] %v178_v47  ;;  %v182_v54 = vadd.f32 %v181_v52, %v1002_v25  ;;  %288 = vst [vmem:[#allocation2 + $0x58] sm:$0xff] %v251_v55  ;;  %v255_v59 = vadd.f32 %v254_v58, %v1006_v28 }
 0x103   :  { %289 = vst [vmem:[#allocation2 + $0x60] sm:$0xff] %v180_v50  ;;  %291 = vst [vmem:[#allocation2 + $0x70] sm:$0xff] %v253_v57 }
 0x104   :  { %290 = vst [vmem:[#allocation2 + $0x68] sm:$0xff] %v182_v54  ;;  %292 = vst [vmem:[#allocation2 + $0x78] sm:$0xff] %v255_v59 }
 0x106   :  { %v185_v60 = vpop.f32.mrb[8].mxu0  ;;  %v258_v1 = vpop.f32.mrb[8].mxu1 }
 0x107   :  { %v186_v61 = vadd.f32 %v185_v60, %v1000_v24  ;;  %v187_v62 = vpop.f32.mrb[9].mxu0  ;;  %v259_v3 = vadd.f32 %v258_v1, %v1004_v26  ;;  %v260_v5 = vpop.f32.mrb[9].mxu1 }
 0x108   :  { %v188_v63 = vadd.f32 %v187_v62, %v1002_v25  ;;  %v189_v0 = vpop.f32.mrb[10].mxu0  ;;  %v261_v7 = vadd.f32 %v260_v5, %v1006_v28  ;;  %v262_v8 = vpop.f32.mrb[10].mxu1 }
 0x109   :  { %293 = vst [vmem:[#allocation2 + $0x80] sm:$0xff] %v186_v61  ;;  %v190_v2 = vadd.f32 %v189_v0, %v1000_v24  ;;  %v191_v4 = vpop.f32.mrb[11].mxu0  ;;  %295 = vst [vmem:[#allocation2 + $0x90] sm:$0xff] %v259_v3  ;;  %v263_v9 = vadd.f32 %v262_v8, %v1004_v26  ;;  %v264_v10 = vpop.f32.mrb[11].mxu1 }
 0x10a   :  { %294 = vst [vmem:[#allocation2 + $0x88] sm:$0xff] %v188_v63  ;;  %v192_v6 = vadd.f32 %v191_v4, %v1002_v25  ;;  %296 = vst [vmem:[#allocation2 + $0x98] sm:$0xff] %v261_v7  ;;  %v265_v11 = vadd.f32 %v264_v10, %v1006_v28 }
 0x10b   :  { %297 = vst [vmem:[#allocation2 + $0xa0] sm:$0xff] %v190_v2  ;;  %299 = vst [vmem:[#allocation2 + $0xb0] sm:$0xff] %v263_v9 }
 0x10c   :  { %298 = vst [vmem:[#allocation2 + $0xa8] sm:$0xff] %v192_v6  ;;  %300 = vst [vmem:[#allocation2 + $0xb8] sm:$0xff] %v265_v11 }
 0x10e   :  { %v195_v12 = vpop.f32.mrb[12].mxu0  ;;  %v268_v17 = vpop.f32.mrb[12].mxu1 }
 0x10f   :  { %v196_v13 = vadd.f32 %v195_v12, %v1000_v24  ;;  %v197_v14 = vpop.f32.mrb[13].mxu0  ;;  %v269_v19 = vadd.f32 %v268_v17, %v1004_v26  ;;  %v270_v21 = vpop.f32.mrb[13].mxu1 }
 0x110   :  { %v198_v15 = vadd.f32 %v197_v14, %v1002_v25  ;;  %v199_v16 = vpop.f32.mrb[14].mxu0  ;;  %v271_v23 = vadd.f32 %v270_v21, %v1006_v28  ;;  %v272_v27 = vpop.f32.mrb[14].mxu1 }
 0x111   :  { %301 = vst [vmem:[#allocation2 + $0xc0] sm:$0xff] %v196_v13  ;;  %v200_v18 = vadd.f32 %v199_v16, %v1000_v24  ;;  %v201_v20 = vpop.f32.mrb[15].mxu0  ;;  %303 = vst [vmem:[#allocation2 + $0xd0] sm:$0xff] %v269_v19  ;;  %v273_v29 = vadd.f32 %v272_v27, %v1004_v26  ;;  %v274_v30 = vpop.f32.mrb[15].mxu1  ;;  %v1040_v24 = vmov 0.0  }
 0x112   :  { %302 = vst [vmem:[#allocation2 + $0xc8] sm:$0xff] %v198_v15  ;;  %v202_v22 = vadd.f32 %v201_v20, %v1002_v25  ;;  %304 = vst [vmem:[#allocation2 + $0xd8] sm:$0xff] %v271_v23  ;;  %v275_v31 = vadd.f32 %v274_v30, %v1006_v28 }
 0x113   :  { %305 = vst [vmem:[#allocation2 + $0xe0] sm:$0xff] %v200_v18  ;;  %307 = vst [vmem:[#allocation2 + $0xf0] sm:$0xff] %v273_v29 }
 0x114   :  { %306 = vst [vmem:[#allocation2 + $0xe8] sm:$0xff] %v202_v22  ;;  %308 = vst [vmem:[#allocation2 + $0xf8] sm:$0xff] %v275_v31 }
 0x115 LB: > { %v764_v25 = vld [vmem:[#allocation3 + $0x4] ss:$16 sps:$4 sm:$0xff]   ;;  %v766_v26 = vld [vmem:[#allocation3] ss:$16 sps:$4 sm:$0xff]   ;;  %v929_v28 = vmov 0   ;;  %v327_v62 = vpack.c.bf16 %v918_v32, %v918_v32  ;;  %s688_s3 = sshll.u32 %s922_s0, 3  ;;  %s922_s0 = sphi %s1044_s0, %s314_s0   ;;  %v918_v32 = vphi %v1042_v32, %v1097_v32   ;;  %v914_v24 = vphi %v1040_v24, %v1096_v24  }
 0x116   : > { %552 = vmatprep.mubr.bf16.mxu0 %v929_v28  ;;  %593 = vmatprep.mubr.bf16.mxu1 %v929_v28  ;;  %v767_v33 = vld [vmem:[#allocation3 + $0x24] ss:$16 sps:$4 sm:$0xff]   ;;  %v769_v34 = vld [vmem:[#allocation3 + $0x20] ss:$16 sps:$4 sm:$0xff]   ;;  %v775_v36 = vld [vmem:[#allocation3 + $0xc] ss:$16 sps:$4 sm:$0xff]  }
 0x117   : > { %520 = vmatprep.subr.bf16.mxu0 %v764_v25  ;;  %v770_v35 = vld [vmem:[#allocation3 + $0x44] ss:$16 sps:$4 sm:$0xff]   ;;  %v778_v37 = vld [vmem:[#allocation3 + $0x8] ss:$16 sps:$4 sm:$0xff]   ;;  %v772_v38 = vld [vmem:[#allocation3 + $0x40] ss:$16 sps:$4 sm:$0xff]   ;;  %561 = vmatprep.subr.bf16.mxu1 %v775_v36 }
 0x118   : > { %521 = vmatpush1.bf16.msra.mxu0 %v766_v26  ;;  %v773_v39 = vld [vmem:[#allocation3 + $0x64] ss:$16 sps:$4 sm:$0xff]   ;;  %562 = vmatpush1.bf16.msra.mxu1 %v778_v37  ;;  %v781_v40 = vld [vmem:[#allocation3 + $0x2c] ss:$16 sps:$4 sm:$0xff]   ;;  %v784_v41 = vld [vmem:[#allocation3 + $0x28] ss:$16 sps:$4 sm:$0xff]  }
 0x119   : > { %522 = vmatprep.subr.bf16.mxu0 %v767_v33  ;;  %563 = vmatprep.subr.bf16.mxu1 %v781_v40  ;;  %v777_v42 = vld [vmem:[#allocation3 + $0x60] ss:$16 sps:$4 sm:$0xff]   ;;  %v779_v43 = vld [vmem:[#allocation3 + $0x84] ss:$16 sps:$4 sm:$0xff]   ;;  %v787_v44 = vld [vmem:[#allocation3 + $0x4c] ss:$16 sps:$4 sm:$0xff]  }
 0x11a   : > { %v790_v45 = vld [vmem:[#allocation3 + $0x48] ss:$16 sps:$4 sm:$0xff]   ;;  %v793_v46 = vld [vmem:[#allocation3 + $0x6c] ss:$16 sps:$4 sm:$0xff]   ;;  %v783_v47 = vld [vmem:[#allocation3 + $0x80] ss:$16 sps:$4 sm:$0xff]  }
 0x11b   : > { %v785_v48 = vld [vmem:[#allocation3 + $0xa4] ss:$16 sps:$4 sm:$0xff]   ;;  %v796_v49 = vld [vmem:[#allocation3 + $0x68] ss:$16 sps:$4 sm:$0xff]   ;;  %v799_v50 = vld [vmem:[#allocation3 + $0x8c] ss:$16 sps:$4 sm:$0xff]  }
 0x11c   : > { %523 = vmatpush1.bf16.msra.mxu0 %v769_v34  ;;  %564 = vmatpush1.bf16.msra.mxu1 %v784_v41  ;;  %v789_v51 = vld [vmem:[#allocation3 + $0xa0] ss:$16 sps:$4 sm:$0xff]   ;;  %v791_v52 = vld [vmem:[#allocation3 + $0xc4] ss:$16 sps:$4 sm:$0xff]   ;;  %v802_v53 = vld [vmem:[#allocation3 + $0x88] ss:$16 sps:$4 sm:$0xff]  }
 0x11d   : > { %524 = vmatprep.subr.bf16.mxu0 %v770_v35  ;;  %565 = vmatprep.subr.bf16.mxu1 %v787_v44  ;;  %v803_v54 = vld [vmem:[#allocation3 + $0xac] ss:$16 sps:$4 sm:$0xff]   ;;  %v795_v55 = vld [vmem:[#allocation3 + $0xc0] ss:$16 sps:$4 sm:$0xff]   ;;  %v797_v56 = vld [vmem:[#allocation3 + $0xe4] ss:$16 sps:$4 sm:$0xff]  }
 0x11e   : > { %v805_v57 = vld [vmem:[#allocation3 + $0xa8] ss:$16 sps:$4 sm:$0xff]   ;;  %v806_v58 = vld [vmem:[#allocation3 + $0xcc] ss:$16 sps:$4 sm:$0xff]   ;;  %v801_v59 = vld [vmem:[#allocation3 + $0xe0] ss:$16 sps:$4 sm:$0xff]  }
 0x11f   : > { %v808_v60 = vld [vmem:[#allocation3 + $0xc8] ss:$16 sps:$4 sm:$0xff]   ;;  %v809_v61 = vld [vmem:[#allocation3 + $0xec] ss:$16 sps:$4 sm:$0xff]   ;;  %s318_s17 = sshra.s32 %s688_s3, 3  ;;  %s314_s0 = sadd.s32 1, %s922_s0  }
 0x120   : > { %525 = vmatpush1.bf16.msra.mxu0 %v772_v38  ;;  %566 = vmatpush1.bf16.msra.mxu1 %v790_v45  ;;  %v811_v63 = vld [vmem:[#allocation3 + $0xe8] ss:$16 sps:$4 sm:$0xff]   ;;  %s726_s18 = sshll.u32 %s318_s17, 5  ;;  %p311_p8 = scmp.ge.s32.totalorder %s314_s0, 8  }
 0x121   : > { %526 = vmatprep.subr.bf16.mxu0 %v773_v39  ;;  %567 = vmatprep.subr.bf16.mxu1 %v793_v46  ;;  %s322_s19 = scalar_lea.vmem [#allocation2], %s726_s18  ;;  %s930_s20 = smov (%p311_p8), [#allocation6]  }
 0x122   : > { %v323_v0 = vld [vmem:[%s322_s19] sm:$0xff]  ;;  %v324_v1 = vld [vmem:[%s322_s19 + $0x8] sm:$0xff]  ;;  %v326_v10 = vld [vmem:[%s322_s19 + $0x18] sm:$0xff]  ;;  %s638_s21 = sshll.u32 (%p311_p8), %s930_s20, 4  ;;  %s931_s22 = smov (%p311_p8), [#allocation7]   ;;  %s639_s21 = int_to_ptr.vmem [resolvable:$true] %s638_s21 }
 0x123   : > { %v325_v16 = vld [vmem:[%s322_s19 + $0x10] sm:$0xff]  ;;  %s648_s23 = sshll.u32 (%p311_p8), %s931_s22, 4  ;;  %s850_s24 = scalar_lea.vmem (%p311_p8), %s639_s21, 128  ;;  %s649_s23 = int_to_ptr.vmem [resolvable:$true] %s648_s23 }
 0x124   : > { %527 = vmatpush1.bf16.msra.mxu0 %v777_v42  ;;  %568 = vmatpush1.bf16.msra.mxu1 %v796_v49  ;;  %p851_p9 = scmp.ne.s32.totalorder (%p311_p8), %s639_s21, %s850_s24  ;;  %p855_p10 = scmp.lt.s32.totalorder (%p311_p8), %s639_s21, %s639_s21 }
 0x125   : > { %528 = vmatprep.subr.bf16.mxu0 %v779_v43  ;;  %569 = vmatprep.subr.bf16.mxu1 %v799_v50  ;;  %p856_p11 = scmp.lt.s32.totalorder (%p311_p8), %s850_s24, %s850_s24 }
 0x127   :  { %p857_p12 = por (%p311_p8), %p856_p11, %p855_p10 }
 0x128   : > { %529 = vmatpush1.bf16.msra.mxu0 %v783_v47  ;;  %570 = vmatpush1.bf16.msra.mxu1 %v802_v53 }
 0x129   : > { %530 = vmatprep.subr.bf16.mxu0 %v785_v48  ;;  %571 = vmatprep.subr.bf16.mxu1 %v803_v54  ;;  %p858_p13 = pnand (%p311_p8), %p857_p12, %p851_p9 }
 0x12c   : > { %531 = vmatpush1.bf16.msra.mxu0 %v789_v51  ;;  %572 = vmatpush1.bf16.msra.mxu1 %v805_v57 }
 0x12d   : > { %532 = vmatprep.subr.bf16.mxu0 %v791_v52  ;;  %573 = vmatprep.subr.bf16.mxu1 %v806_v58 }
 0x130   : > { %533 = vmatpush1.bf16.msra.mxu0 %v795_v55  ;;  %574 = vmatpush1.bf16.msra.mxu1 %v808_v60 }
 0x131   : > { %534 = vmatprep.subr.bf16.mxu0 %v797_v56  ;;  %575 = vmatprep.subr.bf16.mxu1 %v809_v61 }
 0x134   : > { %535 = vmatpush1.bf16.msra.mxu0 %v801_v59  ;;  %576 = vmatpush1.bf16.msra.mxu1 %v811_v63 }
 0x137   : > { %553 = vmatmul.mubr.bf16.vlgmr.msra.gmra.mrb[0].mxu0 %v327_v62  ;;  %594 = vmatmul.mubr.bf16.vlgmr.msra.gmra.mrb[0].mxu1 %v327_v62 }
 0x20a   : > { %v554_v2 = vpop.f32.mrb[0].mxu0  ;;  %v595_v11 = vpop.f32.mrb[0].mxu1 }
 0x20b   : > { %v602_v3 = vadd.f32 %v554_v2, %v323_v0  ;;  %v556_v4 = vpop.f32.mrb[1].mxu0  ;;  %v597_v12 = vpop.f32.mrb[1].mxu1  ;;  %v604_v18 = vadd.f32 %v595_v11, %v325_v16 }
 0x20c   : > { %v603_v5 = vadd.f32 %v556_v4, %v324_v1  ;;  %v558_v6 = vpop.f32.mrb[2].mxu0  ;;  %v605_v13 = vadd.f32 %v597_v12, %v326_v10  ;;  %v599_v14 = vpop.f32.mrb[2].mxu1 }
 0x20d   : > { %v723_v7 = vmul.f32 -1.442695, %v602_v3  ;;  %v559_v8 = vpop.f32.mrb[3].mxu0  ;;  %v600_v15 = vpop.f32.mrb[3].mxu1 }
 0x20e   : > { %v724_v9 = vmul.f32 -1.442695, %v603_v5  ;;  %v725_v17 = vmul.f32 -1.442695, %v605_v13 }
 0x20f   : > { %812 = vpow2.f32 %v723_v7 }
 0x210   : > { %814 = vpow2.f32 %v724_v9 }
 0x211   : > { %816 = vpow2.f32 %v725_v17 }
 0x212   : > { %818 = vtanh.f32 %v604_v18 }
 0x219   : > { %v813_v19 = vpop.eup %812 }
 0x21a   : > { %v815_v20 = vpop.eup %814  ;;  %v609_v21 = vadd.f32 1.0, %v813_v19 }
 0x21b   : > { %v615_v22 = vadd.f32 1.0, %v815_v20  ;;  %v817_v23 = vpop.eup %816 }
 0x21c   : > { %820 = vrcp.f32 %v609_v21  ;;  %v819_v27 = vpop.eup %818  ;;  %v622_v30 = vadd.f32 1.0, %v817_v23 }
 0x21d   : > { %822 = vrcp.f32 %v615_v22 }
 0x21e   : > { %824 = vrcp.f32 %v622_v30 }
 0x226   : > { %v821_v29 = vpop.eup %820 }
 0x227   : > { %v823_v31 = vpop.eup %822  ;;  %v626_v32 = vmul.f32 %v821_v29, %v819_v27 }
 0x228   : > { %v625_v25 = vmul.f32 %v914_v24, %v823_v31  ;;  %v825_v28 = vpop.eup %824 }
 0x22a   : > { %v627_v26 = vadd.f32 %v626_v32, %v625_v25  }
 0x22c   : > { %826 = vtanh.f32 %v627_v26  ;;  %v1096_v24 = vmov %v627_v26  ;;  %631 = vst [vmem:[#allocation7] sm:$0xff] (%p311_p8), %v627_v26 }
 0x233   :  { %313 = sbr.rel (!%p311_p8) target bundleno = 277 (0x115), region = 56 }
 0x236   : > { %v827_v33 = vpop.eup %826 }
 0x237   : > { %v629_v34 = vmul.f32 %v827_v33, %v825_v28  }
 0x239   : > { %v1097_v32 = vmov %v629_v34  ;;  %630 = vst [vmem:[#allocation6] sm:$0xff] (%p311_p8), %v629_v34 }
 0x23a   :  { %861 = shalt.err (!%p858_p13)
}
 0x23b   :  { %s862_s27 = scalar_lea.hbm %s1094_s4, 128 }
 0x23c   :  { %p863_p0 = scmp.ne.s32.totalorder %s1094_s4, %s862_s27  ;;  %p866_p1 = scmp.lt.u32.totalorder %s862_s27, %s1094_s4 }
 0x23e   :  { %p868_p2 = pnand %p866_p1, %p863_p0 }
 0x240   :  { %871 = shalt.err (!%p868_p2)
}
 0x241   :  { %641 = dma.vmem_to_hbm [thread:$0]  %s639_s21, 128, %s1094_s4, [#allocation5]  }
 0x242   :  { %s872_s2 = scalar_lea.vmem %s649_s23, 128  ;;  %p877_p4 = scmp.lt.s32.totalorder %s649_s23, %s649_s23 }
 0x243   :  { %p873_p3 = scmp.ne.s32.totalorder %s649_s23, %s872_s2  ;;  %p878_p5 = scmp.lt.s32.totalorder %s872_s2, %s872_s2 }
 0x245   :  { %p879_p6 = por %p878_p5, %p877_p4 }
 0x247   :  { %p880_p7 = pnand %p879_p6, %p873_p3 }
 0x249   :  { %883 = shalt.err (!%p880_p7)
}
 0x24a   :  { %s884_s10 = scalar_lea.hbm %s1095_s5, 128 }
 0x24b   :  { %p885_p8 = scmp.ne.s32.totalorder %s1095_s5, %s884_s10  ;;  %p888_p9 = scmp.lt.u32.totalorder %s884_s10, %s1095_s5 }
 0x24d   :  { %p890_p10 = pnand %p888_p9, %p885_p8 }
 0x24f   :  { %893 = shalt.err (!%p890_p10)
}
 0x250   :  { %651 = dma.vmem_to_hbm [thread:$0]  %s649_s23, 128, %s1095_s5, [#allocation8]  }
 0x251   :  { %908 = dma.done.wait [#allocation5], 128  }
 0x252   :  { %909 = vsyncadd [#allocation5], 4294967168 }
 0x253   :  { %910 = dma.done.wait [#allocation8], 128  }
 0x254   :  { %911 = vsyncadd [#allocation8], 4294967168 }
 0x255   :  { %658 = vsyncpa [#allocation4], 1 }
 0x256   :  { %659 = vsyncpa [#allocation5], 1 }
 0x257   :  { %660 = vsyncpa [#allocation8], 1 }

</bundles_post_ra>
